<compile_context>
chip_gen: v7x
topology: tpu7x:2x2x1
jax: 0.10.0
libtpu: 0.0.40
codegen_flags: <defaults>
</compile_context>

<pallas_src>
import functools

import jax
import jax.numpy as jnp
from jax.experimental import pallas as pl
from jax.experimental.pallas import tpu as pltpu


def _self_attention_kernel(x_ref, w_ref, b_ref, o_ref, *, use_bf16_matmul):
    # x_ref block: (Bb, S, D); w_ref: (D, 3D) fused [Wq^T | Wk^T | Wv^T]; b_ref: (1, 3D)
    Bb, S, D = x_ref.shape
    x = x_ref[...]                      # already the compute dtype; no redundant cast
    w = w_ref[...]
    b = b_ref[...]

    if use_bf16_matmul:
        # bf16 MXU inputs (2x rate on v6e/v7x), f32 accumulation; softmax stays f32.
        x = x.astype(jnp.bfloat16)
        w = w.astype(jnp.bfloat16)
    mm_dtype = jnp.bfloat16 if use_bf16_matmul else jnp.float32

    # Fused QKV projection: one matmul over the flattened (Bb*S, D) rows -> (Bb*S, 3D).
    x2 = x.reshape(Bb * S, D)
    qkv = jnp.dot(x2, w, preferred_element_type=jnp.float32) + b

    q = qkv[:, 0 * D:1 * D].reshape(Bb, S, D)
    k = qkv[:, 1 * D:2 * D].reshape(Bb, S, D)
    v = qkv[:, 2 * D:3 * D].reshape(Bb, S, D)

    # scores = Q @ K^T / sqrt(D) : batched contraction on the last axes — no explicit
    # jnp.transpose/k.T; the transposed-RHS contraction is fed to the MXU directly.
    scale = 1.0 / (float(D) ** 0.5)
    scores = jnp.einsum(
        "bqd,bkd->bqk", q.astype(mm_dtype), k.astype(mm_dtype),
        preferred_element_type=jnp.float32) * scale                  # (Bb, S, S) f32

    # Softmax over the key axis (PyTorch Softmax(dim=2)); f32 on the VPU, rcp on EUP.
    m = jnp.max(scores, axis=-1, keepdims=True)
    e = jnp.exp(scores - m)
    denom = jnp.sum(e, axis=-1, keepdims=True)
    attn = e * pl.reciprocal(denom, approx=True)                     # (Bb, S, S) f32

    # weighted = attn @ V
    out = jnp.einsum(
        "bqk,bkd->bqd", attn.astype(mm_dtype), v.astype(mm_dtype),
        preferred_element_type=jnp.float32)                          # (Bb, S, D) f32

    # Single contiguous (Bb, S, D) slab store per grid step.
    o_ref[...] = out.astype(o_ref.dtype)


def self_attention(x, wq, bq, wk, bk, wv, bv, *, batch_block=None,
                   use_bf16_matmul=False):
    """x: (B, S, D).  wq/wk/wv: (D, D) stored (out, in) like nn.Linear; bq/bk/bv: (D,)."""
    B, S, D = x.shape
    if batch_block is None:
        batch_block = B                     # small B: whole batch in one grid step
    assert B % batch_block == 0, "batch_block must divide B"

    # Fuse the three projections: y = x @ [Wq^T | Wk^T | Wv^T] + [bq | bk | bv].
    w_qkv = jnp.concatenate([wq.T, wk.T, wv.T], axis=1)              # (D, 3D)
    b_qkv = jnp.concatenate([bq, bk, bv]).reshape(1, 3 * D)          # (1, 3D)

    grid = (B // batch_block,)

    cost = pl.CostEstimate(
        flops=int(B * (2 * S * D * 3 * D + 2 * S * S * D + 2 * S * S * D)),
        transcendentals=int(B * S * S + B * S),
        bytes_accessed=int(4 * (2 * B * S * D + D * 3 * D + 3 * D)),
    )

    kernel = functools.partial(_self_attention_kernel,
                               use_bf16_matmul=use_bf16_matmul)

    # NOTE: for large S/D (esp. v7x's 64 MiB VMEM) add a query-tile grid axis with a
    # flash-style online softmax and single-buffered weights; at these shapes the whole
    # (Bb, S, D) tile plus fused weights is a few hundred KiB, so resident K/V is fine.
    return pl.pallas_call(
        kernel,
        out_shape=jax.ShapeDtypeStruct((B, S, D), x.dtype),
        grid_spec=pltpu.PrefetchScalarGridSpec(
            num_scalar_prefetch=0,
            grid=grid,
            in_specs=[
                pl.BlockSpec((batch_block, S, D), lambda b: (b, 0, 0)),   # x
                pl.BlockSpec((D, 3 * D), lambda b: (0, 0)),               # fused W (constant index_map -> no re-DMA)
                pl.BlockSpec((1, 3 * D), lambda b: (0, 0)),               # fused bias
            ],
            out_specs=pl.BlockSpec((batch_block, S, D), lambda b: (b, 0, 0)),
        ),
        compiler_params=pltpu.CompilerParams(
            dimension_semantics=("parallel",)),
        cost_estimate=cost,
    )(x, w_qkv, b_qkv)


def _reference(x, wq, bq, wk, bk, wv, bv):
    # Pure-JAX reference mirroring the PyTorch forward exactly.
    q = jnp.einsum("bsd,od->bso", x, wq) + bq
    k = jnp.einsum("bsd,od->bso", x, wk) + bk
    v = jnp.einsum("bsd,od->bso", x, wv) + bv
    scores = jnp.einsum("bqd,bkd->bqk", q, k) / (x.shape[-1] ** 0.5)
    attn = jax.nn.softmax(scores, axis=2)
    return jnp.einsum("bqk,bkd->bqd", attn, v)


if __name__ == "__main__":
    B, S, D = 2, 8, 32
    key = jax.random.PRNGKey(0)
    kx, kwq, kbq, kwk, kbk, kwv, kbv = jax.random.split(key, 7)

    x = jax.random.normal(kx, (B, S, D), dtype=jnp.float32)
    # nn.Linear(input_dim, input_dim): weight (out, in) = (D, D), bias (D,)
    bound = 1.0 / (D ** 0.5)
    wq = jax.random.uniform(kwq, (D, D), jnp.float32, -bound, bound)
    bq = jax.random.uniform(kbq, (D,), jnp.float32, -bound, bound)
    wk = jax.random.uniform(kwk, (D, D), jnp.float32, -bound, bound)
    bk = jax.random.uniform(kbk, (D,), jnp.float32, -bound, bound)
    wv = jax.random.uniform(kwv, (D, D), jnp.float32, -bound, bound)
    bv = jax.random.uniform(kbv, (D,), jnp.float32, -bound, bound)

    ref = _reference(x, wq, bq, wk, bk, wv, bv)

    # f32 MXU path (default — tight tolerance; approx reciprocal is the only delta).
    out = self_attention(x, wq, bq, wk, bk, wv, bv)
    out = jax.block_until_ready(out)
    assert out.shape == (B, S, D)
    assert jnp.allclose(out, ref, atol=5e-3, rtol=5e-3)

    # bf16-input MXU path (v6e/v7x optimization; f32 accumulation, looser tolerance).
    out_bf16 = self_attention(x, wq, bq, wk, bk, wv, bv, use_bf16_matmul=True)
    out_bf16 = jax.block_until_ready(out_bf16)
    assert jnp.allclose(out_bf16, ref, atol=5e-2, rtol=5e-2)

    print("KERNEL_OK")
</pallas_src>

<mosaic_0001>
module attributes {stable_mosaic.version = 11 : i64} {
  func.func @_self_attention_kernel(%arg0: i32, %arg1: memref<2x8x32xf32, #tpu.memory_space<vmem>>, %arg2: memref<32x96xf32, #tpu.memory_space<vmem>>, %arg3: memref<1x96xf32, #tpu.memory_space<vmem>>, %arg4: memref<2x8x32xf32, #tpu.memory_space<vmem>>) attributes {dimension_semantics = [#tpu.dimension_semantics<parallel>], iteration_bounds = array<i64: 1>, scalar_prefetch = 0 : i64, scratch_operands = 0 : i64, tpu.core_type = #tpu.core_type<tc>, window_params = [{transform_indices = @transform_0, window_bounds = array<i64: 2, 8, 32>}, {pipeline_mode = #tpu.pipeline_mode<synchronous>, transform_indices = @transform_1, window_bounds = array<i64: 32, 96>}, {pipeline_mode = #tpu.pipeline_mode<synchronous>, transform_indices = @transform_2, window_bounds = array<i64: 1, 96>}, {transform_indices = @transform_3, window_bounds = array<i64: 2, 8, 32>}]} {
    %c0 = arith.constant 0 : index
    %c0_0 = arith.constant 0 : index
    %c0_1 = arith.constant 0 : index
    %0 = vector.load %arg1[%c0, %c0_0, %c0_1] : memref<2x8x32xf32, #tpu.memory_space<vmem>>, vector<2x8x32xf32>
    %c0_2 = arith.constant 0 : index
    %c0_3 = arith.constant 0 : index
    %1 = vector.load %arg2[%c0_2, %c0_3] : memref<32x96xf32, #tpu.memory_space<vmem>>, vector<32x96xf32>
    %c0_4 = arith.constant 0 : index
    %c0_5 = arith.constant 0 : index
    %2 = vector.load %arg3[%c0_4, %c0_5] : memref<1x96xf32, #tpu.memory_space<vmem>>, vector<1x96xf32>
    %3 = vector.shape_cast %0 : vector<2x8x32xf32> to vector<16x32xf32>
    %cst = arith.constant dense<0.000000e+00> : vector<16x96xf32>
    %4 = tpu.matmul %3, %1, %cst {dimension_numbers = #tpu.dot_dimension_numbers<[1], [0], [0], [1], [0, 0, 1, 1], [], []>} : vector<16x32xf32>, vector<32x96xf32>, vector<16x96xf32> -> vector<16x96xf32>
    %5 = vector.broadcast %2 : vector<1x96xf32> to vector<16x96xf32>
    %6 = arith.addf %4, %5 : vector<16x96xf32>
    %7 = vector.extract_strided_slice %6 {offsets = [0, 0], sizes = [16, 32], strides = [1, 1]} : vector<16x96xf32> to vector<16x32xf32>
    %8 = vector.shape_cast %7 : vector<16x32xf32> to vector<2x8x32xf32>
    %9 = vector.extract_strided_slice %6 {offsets = [0, 32], sizes = [16, 32], strides = [1, 1]} : vector<16x96xf32> to vector<16x32xf32>
    %10 = vector.shape_cast %9 : vector<16x32xf32> to vector<2x8x32xf32>
    %11 = vector.extract_strided_slice %6 {offsets = [0, 64], sizes = [16, 32], strides = [1, 1]} : vector<16x96xf32> to vector<16x32xf32>
    %12 = vector.shape_cast %11 : vector<16x32xf32> to vector<2x8x32xf32>
    "tpu.trace_start"() <{level = 10 : i32, message = "bqd,bkd->bqk"}> : () -> ()
    %cst_6 = arith.constant dense<0.000000e+00> : vector<2x8x8xf32>
    %13 = tpu.matmul %8, %10, %cst_6 {dimension_numbers = #tpu.dot_dimension_numbers<[2], [2], [1], [1], [0, 0, 0, 1, 1, 1], [0], [0]>} : vector<2x8x32xf32>, vector<2x8x32xf32>, vector<2x8x8xf32> -> vector<2x8x8xf32>
    "tpu.trace_stop"() : () -> ()
    %cst_7 = arith.constant 0.176776692 : f32
    %14 = vector.broadcast %cst_7 : f32 to vector<2x8x8xf32>
    %15 = arith.mulf %13, %14 : vector<2x8x8xf32>
    %cst_8 = arith.constant dense<0xFF800000> : vector<2x8xf32>
    %16 = vector.multi_reduction <maximumf>, %15, %cst_8 [2] : vector<2x8x8xf32> to vector<2x8xf32>
    %17 = vector.shape_cast %16 : vector<2x8xf32> to vector<2x8x1xf32>
    %18 = vector.broadcast %17 : vector<2x8x1xf32> to vector<2x8x8xf32>
    %19 = arith.subf %15, %18 : vector<2x8x8xf32>
    %20 = math.exp %19 : vector<2x8x8xf32>
    %cst_9 = arith.constant dense<0.000000e+00> : vector<2x8xf32>
    %21 = vector.multi_reduction <add>, %20, %cst_9 [2] : vector<2x8x8xf32> to vector<2x8xf32>
    %22 = vector.shape_cast %21 : vector<2x8xf32> to vector<2x8x1xf32>
    %23 = tpu.reciprocal %22 {approx = true} : vector<2x8x1xf32> -> vector<2x8x1xf32>
    %24 = vector.broadcast %23 : vector<2x8x1xf32> to vector<2x8x8xf32>
    %25 = arith.mulf %20, %24 : vector<2x8x8xf32>
    "tpu.trace_start"() <{level = 10 : i32, message = "bqk,bkd->bqd"}> : () -> ()
    %cst_10 = arith.constant dense<0.000000e+00> : vector<2x8x32xf32>
    %26 = tpu.matmul %25, %12, %cst_10 {dimension_numbers = #tpu.dot_dimension_numbers<[2], [1], [1], [2], [0, 0, 0, 1, 1, 2], [0], [0]>} : vector<2x8x8xf32>, vector<2x8x32xf32>, vector<2x8x32xf32> -> vector<2x8x32xf32>
    "tpu.trace_stop"() : () -> ()
    %c0_11 = arith.constant 0 : index
    %c0_12 = arith.constant 0 : index
    %c0_13 = arith.constant 0 : index
    %27 = vector.load %arg4[%c0_11, %c0_12, %c0_13] : memref<2x8x32xf32, #tpu.memory_space<vmem>>, vector<2x8x32xf32>
    tpu.vector_store %arg4[%c0_11, %c0_12, %c0_13], %26 {strides = array<i32>} : memref<2x8x32xf32, #tpu.memory_space<vmem>>, vector<2x8x32xf32>,
    return
  }
  func.func @transform_0(%arg0: i32) -> (i32, i32, i32) {
    %c0_i32 = arith.constant 0 : i32
    %c0_i32_0 = arith.constant 0 : i32
    %c0_i32_1 = arith.constant 0 : i32
    return %arg0, %c0_i32, %c0_i32_0 : i32, i32, i32
  }
  func.func @transform_1(%arg0: i32) -> (i32, i32) {
    %c0_i32 = arith.constant 0 : i32
    %c0_i32_0 = arith.constant 0 : i32
    %c0_i32_1 = arith.constant 0 : i32
    return %c0_i32, %c0_i32_0 : i32, i32
  }
  func.func @transform_2(%arg0: i32) -> (i32, i32) {
    %c0_i32 = arith.constant 0 : i32
    %c0_i32_0 = arith.constant 0 : i32
    %c0_i32_1 = arith.constant 0 : i32
    return %c0_i32, %c0_i32_0 : i32, i32
  }
  func.func @transform_3(%arg0: i32) -> (i32, i32, i32) {
    %c0_i32 = arith.constant 0 : i32
    %c0_i32_0 = arith.constant 0 : i32
    %c0_i32_1 = arith.constant 0 : i32
    return %arg0, %c0_i32, %c0_i32_0 : i32, i32, i32
  }
}

</mosaic_0001>

<bundles_post_ra>
// kernel: tpu_custom_call.1
= control target key start
LH: loop header
LB: loop body
LE: loop exit
PB: predicated region body
PF: predicated region fallthrough
CT: control target
= control target key end

     0   :  { %8 = vsyncpa [#allocation3], 0  ;;  %s735_s0 = inlined_call_operand.hbm [shape: f32[2,8,32], index: 0, kind: input, shape index: {}]   ;;  %s736_s1 = inlined_call_operand.hbm [shape: f32[32,96], index: 1, kind: input, shape index: {}]   ;;  %s737_s2 = inlined_call_operand.vmem [shape: f32[1,96], index: 2, kind: input, shape index: {}]   ;;  %s738_s3 = inlined_call_operand.hbm [shape: f32[2,8,32], index: 3, kind: output, shape index: {}]  }
   0x1   :  { %9 = vsyncpa [#allocation6], 0 }
   0x2   :  { %10 = vsyncpa [#allocation4], 0  ;;  %s640_s12 = smov [#allocation2]   ;;  %s568_s16 = scalar_lea.hbm %s735_s0, 256 }
   0x3   :  { %s16_s13 = sshll.u32 %s640_s12, 4  ;;  %p569_p0 = scmp.ne.s32.totalorder %s735_s0, %s568_s16  ;;  %s17_s13 = int_to_ptr.vmem [resolvable:$true] %s16_s13 }
   0x4   :  { %p572_p1 = scmp.lt.u32.totalorder %s568_s16, %s735_s0 }
   0x6   :  { %p574_p2 = pnand %p572_p1, %p569_p0 }
   0x8   :  { %577 = shalt.err (!%p574_p2)
}
   0x9   :  { %s578_s21 = scalar_lea.vmem %s17_s13, 256  ;;  %p583_p4 = scmp.lt.s32.totalorder %s17_s13, %s17_s13 }
   0xa   :  { %p579_p3 = scmp.ne.s32.totalorder %s17_s13, %s578_s21  ;;  %p584_p5 = scmp.lt.s32.totalorder %s578_s21, %s578_s21 }
   0xc   :  { %p585_p6 = por %p584_p5, %p583_p4 }
   0xe   :  { %p586_p7 = pnand %p585_p6, %p579_p3 }
  0x10   :  { %589 = shalt.err (!%p586_p7)
}
  0x11   :  { %s641_s22 = smov 128   ;;  %s642_s23 = smov 8  }
  0x12   :  { %22 = dma.hbm_to_vmem [thread:$0]  %s735_s0, 256, %s17_s13, [#allocation3], %s641_s22, %s641_s22, %s642_s23  }
  0x13   :  { %s643_s26 = smov [#allocation5]   ;;  %s590_s30 = scalar_lea.hbm %s736_s1, 512 }
  0x14   :  { %s28_s27 = sshll.u32 %s643_s26, 4  ;;  %p591_p8 = scmp.ne.s32.totalorder %s736_s1, %s590_s30  ;;  %s29_s27 = int_to_ptr.vmem [resolvable:$true] %s28_s27 }
  0x15   :  { %p594_p9 = scmp.lt.u32.totalorder %s590_s30, %s736_s1 }
  0x17   :  { %p596_p10 = pnand %p594_p9, %p591_p8 }
  0x19   :  { %599 = shalt.err (!%p596_p10)
}
  0x1a   :  { %s600_s8 = scalar_lea.vmem %s29_s27, 512  ;;  %p605_p12 = scmp.lt.s32.totalorder %s29_s27, %s29_s27 }
  0x1b   :  { %p601_p11 = scmp.ne.s32.totalorder %s29_s27, %s600_s8  ;;  %p606_p13 = scmp.lt.s32.totalorder %s600_s8, %s600_s8 }
  0x1d   :  { %p607_p0 = por %p606_p13, %p605_p12 }
  0x1f   :  { %p608_p1 = pnand %p607_p0, %p601_p11 }
  0x21   :  { %611 = shalt.err (!%p608_p1)
}
  0x22   :  { %34 = dma.hbm_to_vmem [thread:$0]  %s736_s1, 512, %s29_s27, [#allocation6], %s641_s22, %s641_s22, %s642_s23  }
  0x23   :  { %634 = dma.done.wait [#allocation3], 256  }
  0x24   :  { %635 = vsyncadd [#allocation3], 4294967040 }
  0x25   :  { %636 = dma.done.wait [#allocation6], 512  }
  0x26   :  { %637 = vsyncadd [#allocation6], 4294966784  ;;  %vm56_vm0 = vcmask 261120   ;;  %v45_v0 = vld [vmem:[#allocation5] sm:$0xff]  ;;  %v46_v1 = vld [vmem:[#allocation5 + $0x8] sm:$0xff]  ;;  %v644_v8 = vmov 0.0  }
  0x27   :  { %v47_v2 = vld [vmem:[#allocation5 + $0x10] sm:$0xff]  ;;  %v543_v3 = vpack.c.bf16 %v46_v1, %v45_v0  ;;  %v48_v4 = vld [vmem:[#allocation5 + $0x18] sm:$0xff]  ;;  %523 = vmatprep.subr.mxu1 %v644_v8  ;;  %vm645_vm1 = vmmov 0   ;;  %s646_s11 = smov 96   ;;  %vm294_vm2 = vcmask 64512   ;;  %s648_s12 = smov [#allocation7]  }
  0x28   :  { %v43_v5 = vld [vmem:[#allocation2] sm:$0xff]  ;;  %v547_v6 = vpack.c.bf16 %v48_v4, %v47_v2  ;;  %v44_v7 = vld [vmem:[#allocation2 + $0x8] sm:$0xff]  ;;  %525 = vmatprep.mubr.msk.f32.mxu1 %vm645_vm1, %v644_v8  ;;  %s476_s13 = sshll.u32 %s648_s12, 4  ;;  %s477_s13 = int_to_ptr.vmem [resolvable:$true] %s476_s13 }
  0x29   :  { %520 = vmatprep.mubr.msk.f32.mxu0 %vm56_vm0, %v43_v5  ;;  %544 = vmatprep.subr.bf16.mxu0 %v543_v3  ;;  %v489_v9 = vld [vmem:[%s737_s2] ss:$0 sm:$0xff]  ;;  %s647_s2 = smov 64   ;;  %s612_s14 = scalar_lea.vmem %s477_s13, 256 }
  0x2a   :  { %546 = vmatpush3.bf16.msra.mxu0 %v543_v3  ;;  %p613_p2 = scmp.ne.s32.totalorder %s477_s13, %s612_s14  ;;  %p617_p3 = scmp.lt.s32.totalorder %s477_s13, %s477_s13 }
  0x2b   :  { %548 = vmatprep.subr.bf16.mxu0 %v547_v6  ;;  %p618_p4 = scmp.lt.s32.totalorder %s612_s14, %s612_s14 }
  0x2d   :  { %p619_p5 = por %p618_p4, %p617_p3 }
  0x2e   :  { %550 = vmatpush3.bf16.msra.mxu0 %v547_v6 }
  0x2f   :  { %533 = vmatprep.subr.mxu0 %v644_v8  ;;  %p620_p6 = pnand %p619_p5, %p613_p2 }
  0x31   :  { %521 = vmatmul.mubr.msk.f32.vlgmr.msra.gmra.mrb[0].mxu0 %vm56_vm0, %v44_v7 }
  0x32   :  { %535 = vmatprep.mubr.msk.f32.mxu0 %vm645_vm1, %v644_v8 }
 0x104   :  { %v522_v10 = vpop.f32.mrb[0].mxu0 }
 0x105   :  { %v129_v11 = vpop.f32.mrb[1].mxu0  ;;  %v135_v13 = vadd.f32 %v522_v10, %v489_v9 }
 0x106   :  { %v130_v12 = vadd.f32 %v489_v9, %v129_v11 }
 0x108   :  { %139 = vrot.lane.b32.xlu0 %v130_v12, %s646_s11 }
 0x10c   :  { %216 = vrot.lane.b32.xlu0 %v135_v13, %s646_s11 }
 0x17a   :  { %v140_v14 = vpop.permute.xlu0 %139 }
 0x17b   :  { %524 = vmatpush3.xpose.msk.msra.mxu1 %vm56_vm0, %v140_v14 }
 0x17c   :  { %528 = vmatprep.subr.mxu1 %v644_v8 }
 0x17e   :  { %526 = vmatmul.mubr.msk.f32.vlgmr.msra.gmra.mrb[0].mxu1 %vm56_vm0, %v130_v12  ;;  %v217_v15 = vpop.permute.xlu0 %216 }
 0x17f   :  { %529 = vmatpush3.xpose.msk.msra.mxu1 %vm56_vm0, %v217_v15  ;;  %530 = vmatprep.mubr.msk.f32.mxu1 %vm645_vm1, %v644_v8 }
 0x180   :  { %538 = vmatprep.subr.mxu1 %v644_v8 }
 0x182   :  { %531 = vmatmul.mubr.msk.f32.vlgmr.msra.gmra.mrb[2].mxu1 %vm56_vm0, %v135_v13 }
 0x183   :  { %540 = vmatprep.mubr.msk.f32.mxu1 %vm645_vm1, %v644_v8 }
 0x251   :  { %v211_v16 = vpop.f32.mrb[0].mxu1 }
 0x252   :  { %v292_v17 = vmul.f32 0.17677669, %v211_v16  ;;  %v527_v18 = vpop.f32.mrb[1].mxu1 }
 0x254   :  { %v295_v19 = vsel %vm294_vm2, %v292_v17, -inf }
 0x255   :  { %296 = vmax.xlane.f32.xlu1 %v295_v19  ;;  %v288_v20 = vpop.f32.mrb[2].mxu1 }
 0x256   :  { %v293_v21 = vmul.f32 0.17677669, %v288_v20  ;;  %v532_v22 = vpop.f32.mrb[3].mxu1 }
 0x258   :  { %v298_v23 = vsel %vm294_vm2, %v293_v21, -inf }
 0x259   :  { %299 = vmax.xlane.f32.xlu1 %v298_v23 }
 0x26a   :  { %317 = vrot.lane.b32.xlu1 %v130_v12, %s647_s2 }
 0x2e2   :  { %v297_v24 = vpop.xlane.xlu1 %296 }
 0x2e3   :  { %v301_v25 = vsub.f32 %v292_v17, %v297_v24 }
 0x2e5   :  { %v303_v26 = vmul.f32 1.442695, %v301_v25 }
 0x2e6   :  { %v300_v27 = vpop.xlane.xlu1 %299 }
 0x2e7   :  { %560 = vpow2.f32 %v303_v26  ;;  %v302_v28 = vsub.f32 %v293_v21, %v300_v27 }
 0x2e9   :  { %v305_v29 = vmul.f32 1.442695, %v302_v28 }
 0x2ea   :  { %v318_v30 = vpop.permute.xlu1 %317 }
 0x2eb   :  { %562 = vpow2.f32 %v305_v29  ;;  %534 = vmatpush3.msra.mxu0 %v318_v30 }
 0x2f1   :  { %v561_v31 = vpop.eup %560 }
 0x2f2   :  { %v307_v32 = vsel %vm294_vm2, %v561_v31, 0.0 }
 0x2f3   :  { %308 = vadd.xlane.f32.xlu0 %v307_v32 }
 0x2f5   :  { %v563_v33 = vpop.eup %562 }
 0x2f6   :  { %v310_v34 = vsel %vm294_vm2, %v563_v33, 0.0 }
 0x2f7   :  { %311 = vadd.xlane.f32.xlu1 %v310_v34 }
 0x308   :  { %393 = vrot.lane.b32.xlu1 %v135_v13, %s647_s2 }
 0x380   :  { %v309_v35 = vpop.xlane.xlu0 %308 }
 0x381   :  { %564 = vrcp.f32 %v309_v35 }
 0x384   :  { %v312_v36 = vpop.xlane.xlu1 %311 }
 0x385   :  { %566 = vrcp.f32 %v312_v36 }
 0x388   :  { %v394_v37 = vpop.permute.xlu1 %393 }
 0x389   :  { %539 = vmatpush3.msra.mxu1 %v394_v37 }
 0x38b   :  { %v565_v38 = vpop.eup %564 }
 0x38c   :  { %v315_v39 = vmul.f32 %v565_v38, %v561_v31 }
 0x38e   :  { %536 = vmatmul.mubr.msk.f32.vlgmr.msra.gmra.mrb[2].mxu0 %vm294_vm2, %v315_v39 }
 0x38f   :  { %v567_v40 = vpop.eup %566 }
 0x390   :  { %v316_v41 = vmul.f32 %v567_v40, %v563_v33 }
 0x392   :  { %541 = vmatmul.mubr.msk.f32.vlgmr.msra.gmra.mrb[4].mxu1 %vm294_vm2, %v316_v41 }
 0x461   :  { %v389_v42 = vpop.f32.mrb[2].mxu0 }
 0x462   :  { %469 = vst.msk [vmem:[#allocation7] sm:$0xff] %vm56_vm0, %v389_v42  ;;  %v537_v43 = vpop.f32.mrb[3].mxu0 }
 0x465   :  { %v465_v44 = vpop.f32.mrb[4].mxu1 }
 0x466   :  { %470 = vst.msk [vmem:[#allocation7 + $0x8] sm:$0xff] %vm56_vm0, %v465_v44  ;;  %v542_v45 = vpop.f32.mrb[5].mxu1 }
 0x467   :  { %623 = shalt.err (!%p620_p6)
}
 0x468   :  { %s624_s17 = scalar_lea.hbm %s738_s3, 256 }
 0x469   :  { %p625_p7 = scmp.ne.s32.totalorder %s738_s3, %s624_s17  ;;  %p628_p8 = scmp.lt.u32.totalorder %s624_s17, %s738_s3 }
 0x46b   :  { %p630_p9 = pnand %p628_p8, %p625_p7 }
 0x46d   :  { %633 = shalt.err (!%p630_p9)
}
 0x46e   :  { %482 = dma.vmem_to_hbm [thread:$0]  %s477_s13, 256, %s738_s3, [#allocation4], %s641_s22, %s641_s22, %s642_s23  }
 0x46f   :  { %638 = dma.done.wait [#allocation4], 256  }
 0x470   :  { %639 = vsyncadd [#allocation4], 4294967040 }
 0x471   :  { %486 = vsyncpa [#allocation3], 1 }
 0x472   :  { %487 = vsyncpa [#allocation6], 1 }
 0x473   :  { %488 = vsyncpa [#allocation4], 1 }

</bundles_post_ra>
